<compile_context>
chip_gen: v7x
topology: tpu7x:2x2x1
jax: 0.10.0
libtpu: 0.0.40
codegen_flags: <defaults>
</compile_context>

<pallas_src>
import functools

import jax
import jax.numpy as jnp
from jax.experimental import pallas as pl
from jax.experimental.pallas import tpu as pltpu


def subblock_r_kernel(pos_ref, x_ref, dw_ref, pw_ref, out_ref, d_ref, dsum_ref,
                      *, K, L, NL_true, eps):
    # pos_ref : (1, NLp)  int32  position within its length-L sequence; -L on pad lanes
    # x_ref   : (Cin, NLp) bf16  activations, channels on sublanes, padded N*L on lanes
    # dw_ref  : (Cin, K)   f32   depthwise weights (squeezed)
    # pw_ref  : (Ct, Cin)  f32   pointwise weight tile
    # out_ref : (Ct, NLp)
    # d_ref   : (Cin, NLp) bf16  persistent depthwise output (shared across Cout tiles)
    # dsum_ref: (Cin, 1)   f32   persistent per-channel lane-sum of d
    Cin, NLp = x_ref.shape
    pad = (K - 1) // 2

    # ---- depthwise conv1d (groups=Cin, stride 1, 'same' padding): ONCE -------
    @pl.when(pl.program_id(0) == 0)
    def _():
        x = x_ref[...].astype(jnp.float32)
        dw = dw_ref[...].astype(jnp.float32)
        pos = jnp.broadcast_to(pos_ref[...], (Cin, NLp))   # single hoisted broadcast
        # Center tap initializes the accumulator (pad lanes of x are zero).
        d = x * dw[:, pad:pad + 1]
        for k in range(K):                                  # K small & static: unrolled
            off = k - pad
            if off == 0:
                continue
            shifted = pltpu.roll(x, (-off) % NLp, 1)        # XLU lane rotation, no pad copy
            # Mask cross-sequence / out-of-range lanes; pad lanes carry pos=-L so
            # every shifted tap rejects them -> d is exactly 0 on pad lanes.
            valid = (pos >= -off) & (pos < L - off)
            d = d + jnp.where(valid, shifted, 0.0) * dw[:, k:k + 1]
        dsum_ref[...] = jnp.sum(d, axis=1, keepdims=True)   # per-channel sum, once
        d_ref[...] = d.astype(d_ref.dtype)
    # (depthwise bias omitted: cancelled exactly by the affine=False batch-stat BN)

    # ---- pointwise 1x1 conv: lane-dense bf16 MXU matmul, f32 accumulate ------
    pw = pw_ref[...]
    p = jnp.dot(pw.astype(jnp.bfloat16), d_ref[...],
                preferred_element_type=jnp.float32)          # (Ct, NLp)
    # (pointwise bias omitted for the same reason as above)

    # ---- BatchNorm1d(affine=False), batch statistics per output channel ------
    inv_n = jnp.float32(1.0 / NL_true)
    # Mean from the hoisted per-channel sum: tiny MXU matvec instead of a second
    # full-width XLU lane reduction per Cout tile.
    mean = jnp.dot(pw, dsum_ref[...], preferred_element_type=jnp.float32) * inv_n
    centered = p - mean                                      # pad lanes become -mean
    ssq = jnp.sum(centered * centered, axis=1, keepdims=True)
    n_pad = NLp - NL_true
    if n_pad:                                                # exact pad-lane correction
        ssq = ssq - jnp.float32(n_pad) * mean * mean
    var = jnp.maximum(ssq * inv_n, 0.0)                      # biased variance
    y = centered * jax.lax.rsqrt(var + eps)

    # ---- ReLU ----------------------------------------------------------------
    y = jnp.maximum(y, 0.0)
    # TODO(synk): Dropout(p=0.1) in PyTorch train mode masks & scales by 1/(1-p);
    # deterministic forward here treats it as identity (eval-mode dropout).
    out_ref[...] = y.astype(out_ref.dtype)


def _pick_cout_tile(cout, max_tile=256):
    """Whole Cout when small (single grid step); else the largest multiple-of-8
    divisor <= max_tile (256 fills the v6e/v7x MXU row dimension)."""
    if cout <= max_tile:
        return cout
    best = None
    for t in range(8, max_tile + 1, 8):
        if cout % t == 0:
            best = t
    return best if best is not None else cout


def _vmem_limit_bytes():
    """Generation-aware scoped-VMEM request: ~75% of physical capacity, capped,
    leaving headroom for double buffers / compiler scratch."""
    try:
        cap = int(pltpu.get_tpu_info().vmem_capacity_bytes)
    except Exception:
        cap = 64 * 1024 * 1024            # conservative (v7x-sized) fallback
    return max(32 * 1024 * 1024, min((cap * 3) // 4, 100 * 1024 * 1024))


def subblock_r(x, dw, db, pw, pb, *, kernel_size, eps=1e-5, cout_tile=None):
    """x: (N, Cin, L); dw: (Cin, K); db: (Cin,); pw: (Cout, Cin); pb: (Cout,)."""
    N, Cin, L = x.shape
    Cout = pw.shape[0]
    NL = N * L
    NLp = ((NL + 127) // 128) * 128        # lane-align for unmasked vector stores

    # db / pb are accepted for API parity with the PyTorch module but are NOT
    # used: BatchNorm1d(affine=False) with batch statistics removes any
    # per-output-channel constant offset exactly (valid only because that BN
    # follows the convolutions directly).
    del db, pb

    # Wrapper-side layout plumbing: channels -> sublanes, lane-dense N*L -> lanes.
    # bf16 activations halve the dominant HBM->VMEM transfer on this mem-bound op.
    x2 = jnp.transpose(x, (1, 0, 2)).reshape(Cin, NL).astype(jnp.bfloat16)
    if NLp != NL:
        x2 = jnp.pad(x2, ((0, 0), (0, NLp - NL)))

    # Per-lane position within its length-L sequence; pad lanes get -L so every
    # shifted depthwise tap mask rejects them (keeps BN stats exact).
    lane = jnp.arange(NLp, dtype=jnp.int32)
    pos = jnp.where(lane < NL, lane % L, -L).reshape(1, NLp)

    if cout_tile is None:
        cout_tile = _pick_cout_tile(Cout)
    assert Cout % cout_tile == 0, "Cout must be divisible by cout_tile"
    grid = (Cout // cout_tile,)

    # TODO(synk): for very large N*L (realistic MatchboxNet lengths on v7x's
    # 64 MiB VMEM) add an inner "arbitrary" grid axis over >=2048-lane tiles with
    # BN sums accumulated in VMEM scratch and a second normalization pass.

    kfn = functools.partial(subblock_r_kernel, K=kernel_size, L=L, NL_true=NL, eps=eps)

    def call(single_buffer):
        def const_spec(shape):
            # Constant-index blocks gain nothing from double buffering; request a
            # single buffer to halve their VMEM footprint (biggest win: x2).
            if single_buffer:
                return pl.BlockSpec(shape, lambda i: (0, 0), pipeline_mode=pl.Buffered(1))
            return pl.BlockSpec(shape, lambda i: (0, 0))

        return pl.pallas_call(
            kfn,
            out_shape=jax.ShapeDtypeStruct((Cout, NLp), x.dtype),
            grid_spec=pltpu.PrefetchScalarGridSpec(
                num_scalar_prefetch=0,
                grid=grid,
                in_specs=[
                    const_spec((1, NLp)),                               # position row
                    const_spec((Cin, NLp)),                             # activations
                    const_spec((Cin, kernel_size)),                     # depthwise w
                    pl.BlockSpec((cout_tile, Cin), lambda i: (i, 0)),   # pointwise tile
                ],
                out_specs=pl.BlockSpec((cout_tile, NLp), lambda i: (i, 0)),
                scratch_shapes=[
                    pltpu.VMEM((Cin, NLp), jnp.bfloat16),   # persistent depthwise out
                    pltpu.VMEM((Cin, 1), jnp.float32),      # persistent per-chan sum
                ],
            ),
            compiler_params=pltpu.CompilerParams(
                # "arbitrary": the program_id==0 depthwise guard must run before the
                # other grid steps (a "parallel" axis on megacore would skip it).
                dimension_semantics=("arbitrary",),
                vmem_limit_bytes=_vmem_limit_bytes(),
            ),
        )(pos, x2, dw, pw)

    try:
        out2 = call(single_buffer=hasattr(pl, "Buffered"))
    except Exception:          # pipeline_mode/Buffered unsupported -> default buffering
        out2 = call(single_buffer=False)

    if NLp != NL:
        out2 = out2[:, :NL]
    # (Cout, N*L) -> (N, Cout, L): wrapper-side layout plumbing only.
    return out2.reshape(Cout, N, L).transpose(1, 0, 2)


def _reference(x, dw, db, pw, pb, kernel_size, eps=1e-5):
    """Pure-JAX f32 reference of the same forward pass (with biases)."""
    pad = (kernel_size - 1) // 2
    xpad = jnp.pad(x, ((0, 0), (0, 0), (pad, pad)))
    L = x.shape[2]
    d = sum(xpad[:, :, k:k + L] * dw[:, k][None, :, None] for k in range(kernel_size))
    d = d + db[None, :, None]
    p = jnp.einsum('oc,ncl->nol', pw, d) + pb[None, :, None]
    mean = jnp.mean(p, axis=(0, 2), keepdims=True)
    var = jnp.mean(jnp.square(p - mean), axis=(0, 2), keepdims=True)
    return jnp.maximum((p - mean) / jnp.sqrt(var + eps), 0.0)


if __name__ == "__main__":
    # Small MatchboxNet-like shapes; L is deliberately NOT a multiple of 128 to
    # exercise the lane-padding / masked-statistics path.
    N, Cin, Cout, L, K = 2, 8, 16, 120, 3

    key = jax.random.PRNGKey(0)
    k1, k2, k3, k4, k5 = jax.random.split(key, 5)

    x = jax.random.normal(k1, (N, Cin, L), jnp.float32)
    # Conv1d weights (shapes from __init__), stored squeezed:
    #   depth_cnn.weight: (Cin, 1, K) -> (Cin, K); point_cnn.weight: (Cout, Cin, 1) -> (Cout, Cin)
    dw = jax.random.normal(k2, (Cin, K), jnp.float32) * 0.5
    db = jax.random.normal(k3, (Cin,), jnp.float32) * 0.1
    pw = jax.random.normal(k4, (Cout, Cin), jnp.float32) * 0.3
    pb = jax.random.normal(k5, (Cout,), jnp.float32) * 0.1

    ref = _reference(x, dw, db, pw, pb, K)

    # Default tiling: Cout is small -> a single grid step (no replicated work).
    out1 = jax.block_until_ready(subblock_r(x, dw, db, pw, pb, kernel_size=K))
    # Forced 2-tile grid: exercises the persistent depthwise-scratch reuse path.
    out2 = jax.block_until_ready(subblock_r(x, dw, db, pw, pb, kernel_size=K, cout_tile=8))

    for out in (out1, out2):
        assert out.shape == (N, Cout, L)
        max_err = float(jnp.max(jnp.abs(out - ref)))
        # bf16 activations + bf16 MXU inputs (f32 accumulate) vs f32 reference.
        assert jnp.allclose(out, ref, atol=4e-2, rtol=4e-2), \
            f"mismatch vs reference (max abs err {max_err})"

    print("KERNEL_OK")
</pallas_src>

<mosaic_0001>
module attributes {stable_mosaic.version = 11 : i64} {
  func.func @subblock_r_kernel(%arg0: i32, %arg1: memref<1x256xi32, #tpu.memory_space<vmem>>, %arg2: memref<8x256xbf16, #tpu.memory_space<vmem>>, %arg3: memref<8x3xf32, #tpu.memory_space<vmem>>, %arg4: memref<16x8xf32, #tpu.memory_space<vmem>>, %arg5: memref<16x256xf32, #tpu.memory_space<vmem>>, %arg6: memref<8x256xbf16, #tpu.memory_space<vmem>>, %arg7: memref<8x1xf32, #tpu.memory_space<vmem>>) attributes {dimension_semantics = [#tpu.dimension_semantics<arbitrary>], iteration_bounds = array<i64: 1>, scalar_prefetch = 0 : i64, scratch_operands = 2 : i64, tpu.core_type = #tpu.core_type<tc>, window_params = [{pipeline_mode = #tpu.pipeline_mode<synchronous>, transform_indices = @transform_0, window_bounds = array<i64: 1, 256>}, {pipeline_mode = #tpu.pipeline_mode<synchronous>, transform_indices = @transform_1, window_bounds = array<i64: 8, 256>}, {pipeline_mode = #tpu.pipeline_mode<synchronous>, transform_indices = @transform_2, window_bounds = array<i64: 8, 3>}, {transform_indices = @transform_3, window_bounds = array<i64: 16, 8>}, {transform_indices = @transform_4, window_bounds = array<i64: 16, 256>}]} {
    %c0_i32 = arith.constant 0 : i32
    %0 = arith.cmpi eq, %arg0, %c0_i32 : i32
    %1 = arith.extui %0 : i1 to i32
    %c0_i32_0 = arith.constant 0 : i32
    %2 = arith.cmpi ne, %1, %c0_i32_0 : i32
    scf.if %2 {
      %c0_16 = arith.constant 0 : index
      %c0_17 = arith.constant 0 : index
      %32 = vector.load %arg2[%c0_16, %c0_17] : memref<8x256xbf16, #tpu.memory_space<vmem>>, vector<8x256xbf16>
      %33 = arith.extf %32 : vector<8x256xbf16> to vector<8x256xf32>
      %c0_18 = arith.constant 0 : index
      %c0_19 = arith.constant 0 : index
      %34 = vector.load %arg3[%c0_18, %c0_19] : memref<8x3xf32, #tpu.memory_space<vmem>>, vector<8x3xf32>
      %c0_20 = arith.constant 0 : index
      %c0_21 = arith.constant 0 : index
      %35 = vector.load %arg1[%c0_20, %c0_21] : memref<1x256xi32, #tpu.memory_space<vmem>>, vector<1x256xi32>
      %36 = vector.shape_cast %35 : vector<1x256xi32> to vector<1x256xi32>
      %37 = vector.broadcast %36 : vector<1x256xi32> to vector<8x256xi32>
      %38 = vector.extract_strided_slice %34 {offsets = [0, 1], sizes = [8, 1], strides = [1, 1]} : vector<8x3xf32> to vector<8x1xf32>
      %39 = vector.broadcast %38 : vector<8x1xf32> to vector<8x256xf32>
      %40 = arith.mulf %33, %39 : vector<8x256xf32>
      %c1_i32 = arith.constant 1 : i32
      %41 = tpu.dynamic_rotate %33 by %c1_i32 dim 1 : vector<8x256xf32>, i32 -> vector<8x256xf32>
      %c1_i32_22 = arith.constant 1 : i32
      %42 = vector.broadcast %c1_i32_22 : i32 to vector<8x256xi32>
      %43 = arith.cmpi sge, %37, %42 : vector<8x256xi32>
      %c121_i32 = arith.constant 121 : i32
      %44 = vector.broadcast %c121_i32 : i32 to vector<8x256xi32>
      %45 = arith.cmpi slt, %37, %44 : vector<8x256xi32>
      %46 = arith.andi %43, %45 : vector<8x256xi1>
      %cst_23 = arith.constant 0.000000e+00 : f32
      %47 = vector.broadcast %cst_23 : f32 to vector<8x256xf32>
      %48 = arith.select %46, %41, %47 : vector<8x256xi1>, vector<8x256xf32>
      %49 = vector.extract_strided_slice %34 {offsets = [0, 0], sizes = [8, 1], strides = [1, 1]} : vector<8x3xf32> to vector<8x1xf32>
      %50 = vector.broadcast %49 : vector<8x1xf32> to vector<8x256xf32>
      %51 = arith.mulf %48, %50 : vector<8x256xf32>
      %52 = arith.addf %40, %51 : vector<8x256xf32>
      %c255_i32 = arith.constant 255 : i32
      %53 = tpu.dynamic_rotate %33 by %c255_i32 dim 1 : vector<8x256xf32>, i32 -> vector<8x256xf32>
      %c-1_i32 = arith.constant -1 : i32
      %54 = vector.broadcast %c-1_i32 : i32 to vector<8x256xi32>
      %55 = arith.cmpi sge, %37, %54 : vector<8x256xi32>
      %c119_i32 = arith.constant 119 : i32
      %56 = vector.broadcast %c119_i32 : i32 to vector<8x256xi32>
      %57 = arith.cmpi slt, %37, %56 : vector<8x256xi32>
      %58 = arith.andi %55, %57 : vector<8x256xi1>
      %cst_24 = arith.constant 0.000000e+00 : f32
      %59 = vector.broadcast %cst_24 : f32 to vector<8x256xf32>
      %60 = arith.select %58, %53, %59 : vector<8x256xi1>, vector<8x256xf32>
      %61 = vector.extract_strided_slice %34 {offsets = [0, 2], sizes = [8, 1], strides = [1, 1]} : vector<8x3xf32> to vector<8x1xf32>
      %62 = vector.broadcast %61 : vector<8x1xf32> to vector<8x256xf32>
      %63 = arith.mulf %60, %62 : vector<8x256xf32>
      %64 = arith.addf %52, %63 : vector<8x256xf32>
      %cst_25 = arith.constant dense<0.000000e+00> : vector<8xf32>
      %65 = vector.multi_reduction <add>, %64, %cst_25 [1] : vector<8x256xf32> to vector<8xf32>
      %66 = vector.shape_cast %65 : vector<8xf32> to vector<8x1xf32>
      %c0_26 = arith.constant 0 : index
      %c0_27 = arith.constant 0 : index
      %67 = vector.load %arg7[%c0_26, %c0_27] : memref<8x1xf32, #tpu.memory_space<vmem>>, vector<8x1xf32>
      tpu.vector_store %arg7[%c0_26, %c0_27], %66 {strides = array<i32>} : memref<8x1xf32, #tpu.memory_space<vmem>>, vector<8x1xf32>,
      %68 = arith.truncf %64 : vector<8x256xf32> to vector<8x256xbf16>
      %c0_28 = arith.constant 0 : index
      %c0_29 = arith.constant 0 : index
      %69 = vector.load %arg6[%c0_28, %c0_29] : memref<8x256xbf16, #tpu.memory_space<vmem>>, vector<8x256xbf16>
      tpu.vector_store %arg6[%c0_28, %c0_29], %68 {strides = array<i32>} : memref<8x256xbf16, #tpu.memory_space<vmem>>, vector<8x256xbf16>,
    } else {
    }
    %c0 = arith.constant 0 : index
    %c0_1 = arith.constant 0 : index
    %3 = vector.load %arg4[%c0, %c0_1] : memref<16x8xf32, #tpu.memory_space<vmem>>, vector<16x8xf32>
    %4 = arith.truncf %3 : vector<16x8xf32> to vector<16x8xbf16>
    %c0_2 = arith.constant 0 : index
    %c0_3 = arith.constant 0 : index
    %5 = vector.load %arg6[%c0_2, %c0_3] : memref<8x256xbf16, #tpu.memory_space<vmem>>, vector<8x256xbf16>
    %cst = arith.constant dense<0.000000e+00> : vector<16x256xf32>
    %6 = tpu.matmul %4, %5, %cst {dimension_numbers = #tpu.dot_dimension_numbers<[1], [0], [0], [1], [0, 0, 1, 1], [], []>} : vector<16x8xbf16>, vector<8x256xbf16>, vector<16x256xf32> -> vector<16x256xf32>
    %c0_4 = arith.constant 0 : index
    %c0_5 = arith.constant 0 : index
    %7 = vector.load %arg7[%c0_4, %c0_5] : memref<8x1xf32, #tpu.memory_space<vmem>>, vector<8x1xf32>
    %cst_6 = arith.constant dense<0.000000e+00> : vector<16x1xf32>
    %8 = tpu.matmul %3, %7, %cst_6 {dimension_numbers = #tpu.dot_dimension_numbers<[1], [0], [0], [1], [0, 0, 1, 1], [], []>} : vector<16x8xf32>, vector<8x1xf32>, vector<16x1xf32> -> vector<16x1xf32>
    %cst_7 = arith.constant 0.00416666688 : f32
    %9 = vector.broadcast %cst_7 : f32 to vector<16x1xf32>
    %10 = arith.mulf %8, %9 : vector<16x1xf32>
    %11 = vector.broadcast %10 : vector<16x1xf32> to vector<16x256xf32>
    %12 = arith.subf %6, %11 : vector<16x256xf32>
    %13 = arith.mulf %12, %12 : vector<16x256xf32>
    %cst_8 = arith.constant dense<0.000000e+00> : vector<16xf32>
    %14 = vector.multi_reduction <add>, %13, %cst_8 [1] : vector<16x256xf32> to vector<16xf32>
    %15 = vector.shape_cast %14 : vector<16xf32> to vector<16x1xf32>
    %cst_9 = arith.constant 1.600000e+01 : f32
    %16 = vector.broadcast %cst_9 : f32 to vector<16x1xf32>
    %17 = arith.mulf %16, %10 : vector<16x1xf32>
    %18 = arith.mulf %17, %10 : vector<16x1xf32>
    %19 = arith.subf %15, %18 : vector<16x1xf32>
    %cst_10 = arith.constant 0.00416666688 : f32
    %20 = vector.broadcast %cst_10 : f32 to vector<16x1xf32>
    %21 = arith.mulf %19, %20 : vector<16x1xf32>
    %cst_11 = arith.constant 0.000000e+00 : f32
    %22 = vector.broadcast %cst_11 : f32 to vector<16x1xf32>
    %23 = arith.maximumf %21, %22 : vector<16x1xf32>
    %cst_12 = arith.constant 9.99999974E-6 : f32
    %24 = vector.broadcast %cst_12 : f32 to vector<16x1xf32>
    %25 = arith.addf %23, %24 : vector<16x1xf32>
    %26 = math.rsqrt %25 : vector<16x1xf32>
    %27 = vector.broadcast %26 : vector<16x1xf32> to vector<16x256xf32>
    %28 = arith.mulf %12, %27 : vector<16x256xf32>
    %cst_13 = arith.constant 0.000000e+00 : f32
    %29 = vector.broadcast %cst_13 : f32 to vector<16x256xf32>
    %30 = arith.maximumf %28, %29 : vector<16x256xf32>
    %c0_14 = arith.constant 0 : index
    %c0_15 = arith.constant 0 : index
    %31 = vector.load %arg5[%c0_14, %c0_15] : memref<16x256xf32, #tpu.memory_space<vmem>>, vector<16x256xf32>
    tpu.vector_store %arg5[%c0_14, %c0_15], %30 {strides = array<i32>} : memref<16x256xf32, #tpu.memory_space<vmem>>, vector<16x256xf32>,
    return
  }
  func.func @transform_0(%arg0: i32) -> (i32, i32) {
    %c0_i32 = arith.constant 0 : i32
    %c0_i32_0 = arith.constant 0 : i32
    %c0_i32_1 = arith.constant 0 : i32
    return %c0_i32, %c0_i32_0 : i32, i32
  }
  func.func @transform_1(%arg0: i32) -> (i32, i32) {
    %c0_i32 = arith.constant 0 : i32
    %c0_i32_0 = arith.constant 0 : i32
    %c0_i32_1 = arith.constant 0 : i32
    return %c0_i32, %c0_i32_0 : i32, i32
  }
  func.func @transform_2(%arg0: i32) -> (i32, i32) {
    %c0_i32 = arith.constant 0 : i32
    %c0_i32_0 = arith.constant 0 : i32
    %c0_i32_1 = arith.constant 0 : i32
    return %c0_i32, %c0_i32_0 : i32, i32
  }
  func.func @transform_3(%arg0: i32) -> (i32, i32) {
    %c0_i32 = arith.constant 0 : i32
    %c0_i32_0 = arith.constant 0 : i32
    return %arg0, %c0_i32 : i32, i32
  }
  func.func @transform_4(%arg0: i32) -> (i32, i32) {
    %c0_i32 = arith.constant 0 : i32
    %c0_i32_0 = arith.constant 0 : i32
    return %arg0, %c0_i32 : i32, i32
  }
}

module attributes {stable_mosaic.version = 11 : i64} {
  func.func @subblock_r_kernel(%arg0: i32, %arg1: memref<1x256xi32, #tpu.memory_space<vmem>>, %arg2: memref<8x256xbf16, #tpu.memory_space<vmem>>, %arg3: memref<8x3xf32, #tpu.memory_space<vmem>>, %arg4: memref<16x8xf32, #tpu.memory_space<vmem>>, %arg5: memref<16x256xf32, #tpu.memory_space<vmem>>, %arg6: memref<8x256xbf16, #tpu.memory_space<vmem>>, %arg7: memref<8x1xf32, #tpu.memory_space<vmem>>) attributes {dimension_semantics = [#tpu.dimension_semantics<arbitrary>], iteration_bounds = array<i64: 1>, scalar_prefetch = 0 : i64, scratch_operands = 2 : i64, tpu.core_type = #tpu.core_type<tc>, window_params = [{pipeline_mode = #tpu.pipeline_mode<synchronous>, transform_indices = @transform_0, window_bounds = array<i64: 1, 256>}, {pipeline_mode = #tpu.pipeline_mode<synchronous>, transform_indices = @transform_1, window_bounds = array<i64: 8, 256>}, {pipeline_mode = #tpu.pipeline_mode<synchronous>, transform_indices = @transform_2, window_bounds = array<i64: 8, 3>}, {transform_indices = @transform_3, window_bounds = array<i64: 16, 8>}, {transform_indices = @transform_4, window_bounds = array<i64: 16, 256>}]} {
    %c0_i32 = arith.constant 0 : i32
    %0 = arith.cmpi eq, %arg0, %c0_i32 : i32
    %1 = arith.extui %0 : i1 to i32
    %c0_i32_0 = arith.constant 0 : i32
    %2 = arith.cmpi ne, %1, %c0_i32_0 : i32
    scf.if %2 {
      %c0_16 = arith.constant 0 : index
      %c0_17 = arith.constant 0 : index
      %32 = vector.load %arg2[%c0_16, %c0_17] : memref<8x256xbf16, #tpu.memory_space<vmem>>, vector<8x256xbf16>
      %33 = arith.extf %32 : vector<8x256xbf16> to vector<8x256xf32>
      %c0_18 = arith.constant 0 : index
      %c0_19 = arith.constant 0 : index
      %34 = vector.load %arg3[%c0_18, %c0_19] : memref<8x3xf32, #tpu.memory_space<vmem>>, vector<8x3xf32>
      %c0_20 = arith.constant 0 : index
      %c0_21 = arith.constant 0 : index
      %35 = vector.load %arg1[%c0_20, %c0_21] : memref<1x256xi32, #tpu.memory_space<vmem>>, vector<1x256xi32>
      %36 = vector.shape_cast %35 : vector<1x256xi32> to vector<1x256xi32>
      %37 = vector.broadcast %36 : vector<1x256xi32> to vector<8x256xi32>
      %38 = vector.extract_strided_slice %34 {offsets = [0, 1], sizes = [8, 1], strides = [1, 1]} : vector<8x3xf32> to vector<8x1xf32>
      %39 = vector.broadcast %38 : vector<8x1xf32> to vector<8x256xf32>
      %40 = arith.mulf %33, %39 : vector<8x256xf32>
      %c1_i32 = arith.constant 1 : i32
      %41 = tpu.dynamic_rotate %33 by %c1_i32 dim 1 : vector<8x256xf32>, i32 -> vector<8x256xf32>
      %c1_i32_22 = arith.constant 1 : i32
      %42 = vector.broadcast %c1_i32_22 : i32 to vector<8x256xi32>
      %43 = arith.cmpi sge, %37, %42 : vector<8x256xi32>
      %c121_i32 = arith.constant 121 : i32
      %44 = vector.broadcast %c121_i32 : i32 to vector<8x256xi32>
      %45 = arith.cmpi slt, %37, %44 : vector<8x256xi32>
      %46 = arith.andi %43, %45 : vector<8x256xi1>
      %cst_23 = arith.constant 0.000000e+00 : f32
      %47 = vector.broadcast %cst_23 : f32 to vector<8x256xf32>
      %48 = arith.select %46, %41, %47 : vector<8x256xi1>, vector<8x256xf32>
      %49 = vector.extract_strided_slice %34 {offsets = [0, 0], sizes = [8, 1], strides = [1, 1]} : vector<8x3xf32> to vector<8x1xf32>
      %50 = vector.broadcast %49 : vector<8x1xf32> to vector<8x256xf32>
      %51 = arith.mulf %48, %50 : vector<8x256xf32>
      %52 = arith.addf %40, %51 : vector<8x256xf32>
      %c255_i32 = arith.constant 255 : i32
      %53 = tpu.dynamic_rotate %33 by %c255_i32 dim 1 : vector<8x256xf32>, i32 -> vector<8x256xf32>
      %c-1_i32 = arith.constant -1 : i32
      %54 = vector.broadcast %c-1_i32 : i32 to vector<8x256xi32>
      %55 = arith.cmpi sge, %37, %54 : vector<8x256xi32>
      %c119_i32 = arith.constant 119 : i32
      %56 = vector.broadcast %c119_i32 : i32 to vector<8x256xi32>
      %57 = arith.cmpi slt, %37, %56 : vector<8x256xi32>
      %58 = arith.andi %55, %57 : vector<8x256xi1>
      %cst_24 = arith.constant 0.000000e+00 : f32
      %59 = vector.broadcast %cst_24 : f32 to vector<8x256xf32>
      %60 = arith.select %58, %53, %59 : vector<8x256xi1>, vector<8x256xf32>
      %61 = vector.extract_strided_slice %34 {offsets = [0, 2], sizes = [8, 1], strides = [1, 1]} : vector<8x3xf32> to vector<8x1xf32>
      %62 = vector.broadcast %61 : vector<8x1xf32> to vector<8x256xf32>
      %63 = arith.mulf %60, %62 : vector<8x256xf32>
      %64 = arith.addf %52, %63 : vector<8x256xf32>
      %cst_25 = arith.constant dense<0.000000e+00> : vector<8xf32>
      %65 = vector.multi_reduction <add>, %64, %cst_25 [1] : vector<8x256xf32> to vector<8xf32>
      %66 = vector.shape_cast %65 : vector<8xf32> to vector<8x1xf32>
      %c0_26 = arith.constant 0 : index
      %c0_27 = arith.constant 0 : index
      %67 = vector.load %arg7[%c0_26, %c0_27] : memref<8x1xf32, #tpu.memory_space<vmem>>, vector<8x1xf32>
      tpu.vector_store %arg7[%c0_26, %c0_27], %66 {strides = array<i32>} : memref<8x1xf32, #tpu.memory_space<vmem>>, vector<8x1xf32>,
      %68 = arith.truncf %64 : vector<8x256xf32> to vector<8x256xbf16>
      %c0_28 = arith.constant 0 : index
      %c0_29 = arith.constant 0 : index
      %69 = vector.load %arg6[%c0_28, %c0_29] : memref<8x256xbf16, #tpu.memory_space<vmem>>, vector<8x256xbf16>
      tpu.vector_store %arg6[%c0_28, %c0_29], %68 {strides = array<i32>} : memref<8x256xbf16, #tpu.memory_space<vmem>>, vector<8x256xbf16>,
    } else {
    }
    %c0 = arith.constant 0 : index
    %c0_1 = arith.constant 0 : index
    %3 = vector.load %arg4[%c0, %c0_1] : memref<16x8xf32, #tpu.memory_space<vmem>>, vector<16x8xf32>
    %4 = arith.truncf %3 : vector<16x8xf32> to vector<16x8xbf16>
    %c0_2 = arith.constant 0 : index
    %c0_3 = arith.constant 0 : index
    %5 = vector.load %arg6[%c0_2, %c0_3] : memref<8x256xbf16, #tpu.memory_space<vmem>>, vector<8x256xbf16>
    %cst = arith.constant dense<0.000000e+00> : vector<16x256xf32>
    %6 = tpu.matmul %4, %5, %cst {dimension_numbers = #tpu.dot_dimension_numbers<[1], [0], [0], [1], [0, 0, 1, 1], [], []>} : vector<16x8xbf16>, vector<8x256xbf16>, vector<16x256xf32> -> vector<16x256xf32>
    %c0_4 = arith.constant 0 : index
    %c0_5 = arith.constant 0 : index
    %7 = vector.load %arg7[%c0_4, %c0_5] : memref<8x1xf32, #tpu.memory_space<vmem>>, vector<8x1xf32>
    %cst_6 = arith.constant dense<0.000000e+00> : vector<16x1xf32>
    %8 = tpu.matmul %3, %7, %cst_6 {dimension_numbers = #tpu.dot_dimension_numbers<[1], [0], [0], [1], [0, 0, 1, 1], [], []>} : vector<16x8xf32>, vector<8x1xf32>, vector<16x1xf32> -> vector<16x1xf32>
    %cst_7 = arith.constant 0.00416666688 : f32
    %9 = vector.broadcast %cst_7 : f32 to vector<16x1xf32>
    %10 = arith.mulf %8, %9 : vector<16x1xf32>
    %11 = vector.broadcast %10 : vector<16x1xf32> to vector<16x256xf32>
    %12 = arith.subf %6, %11 : vector<16x256xf32>
    %13 = arith.mulf %12, %12 : vector<16x256xf32>
    %cst_8 = arith.constant dense<0.000000e+00> : vector<16xf32>
    %14 = vector.multi_reduction <add>, %13, %cst_8 [1] : vector<16x256xf32> to vector<16xf32>
    %15 = vector.shape_cast %14 : vector<16xf32> to vector<16x1xf32>
    %cst_9 = arith.constant 1.600000e+01 : f32
    %16 = vector.broadcast %cst_9 : f32 to vector<16x1xf32>
    %17 = arith.mulf %16, %10 : vector<16x1xf32>
    %18 = arith.mulf %17, %10 : vector<16x1xf32>
    %19 = arith.subf %15, %18 : vector<16x1xf32>
    %cst_10 = arith.constant 0.00416666688 : f32
    %20 = vector.broadcast %cst_10 : f32 to vector<16x1xf32>
    %21 = arith.mulf %19, %20 : vector<16x1xf32>
    %cst_11 = arith.constant 0.000000e+00 : f32
    %22 = vector.broadcast %cst_11 : f32 to vector<16x1xf32>
    %23 = arith.maximumf %21, %22 : vector<16x1xf32>
    %cst_12 = arith.constant 9.99999974E-6 : f32
    %24 = vector.broadcast %cst_12 : f32 to vector<16x1xf32>
    %25 = arith.addf %23, %24 : vector<16x1xf32>
    %26 = math.rsqrt %25 : vector<16x1xf32>
    %27 = vector.broadcast %26 : vector<16x1xf32> to vector<16x256xf32>
    %28 = arith.mulf %12, %27 : vector<16x256xf32>
    %cst_13 = arith.constant 0.000000e+00 : f32
    %29 = vector.broadcast %cst_13 : f32 to vector<16x256xf32>
    %30 = arith.maximumf %28, %29 : vector<16x256xf32>
    %c0_14 = arith.constant 0 : index
    %c0_15 = arith.constant 0 : index
    %31 = vector.load %arg5[%c0_14, %c0_15] : memref<16x256xf32, #tpu.memory_space<vmem>>, vector<16x256xf32>
    tpu.vector_store %arg5[%c0_14, %c0_15], %30 {strides = array<i32>} : memref<16x256xf32, #tpu.memory_space<vmem>>, vector<16x256xf32>,
    return
  }
  func.func @transform_0(%arg0: i32) -> (i32, i32) {
    %c0_i32 = arith.constant 0 : i32
    %c0_i32_0 = arith.constant 0 : i32
    %c0_i32_1 = arith.constant 0 : i32
    return %c0_i32, %c0_i32_0 : i32, i32
  }
  func.func @transform_1(%arg0: i32) -> (i32, i32) {
    %c0_i32 = arith.constant 0 : i32
    %c0_i32_0 = arith.constant 0 : i32
    %c0_i32_1 = arith.constant 0 : i32
    return %c0_i32, %c0_i32_0 : i32, i32
  }
  func.func @transform_2(%arg0: i32) -> (i32, i32) {
    %c0_i32 = arith.constant 0 : i32
    %c0_i32_0 = arith.constant 0 : i32
    %c0_i32_1 = arith.constant 0 : i32
    return %c0_i32, %c0_i32_0 : i32, i32
  }
  func.func @transform_3(%arg0: i32) -> (i32, i32) {
    %c0_i32 = arith.constant 0 : i32
    %c0_i32_0 = arith.constant 0 : i32
    return %arg0, %c0_i32 : i32, i32
  }
  func.func @transform_4(%arg0: i32) -> (i32, i32) {
    %c0_i32 = arith.constant 0 : i32
    %c0_i32_0 = arith.constant 0 : i32
    return %arg0, %c0_i32 : i32, i32
  }
}

</mosaic_0001>

<bundles_post_ra>
// kernel: tpu_custom_call.1
= control target key start
LH: loop header
LB: loop body
LE: loop exit
PB: predicated region body
PF: predicated region fallthrough
CT: control target
= control target key end

     0   :  { %v396_v2 = vmov 2   ;;  %v397_v3 = vmov 1   ;;  %s462_s0 = inlined_call_operand.vmem [shape: s32[1,256], index: 0, kind: input, shape index: {}]   ;;  %s463_s1 = inlined_call_operand.vmem [shape: bf16[8,256], index: 1, kind: input, shape index: {}]   ;;  %s464_s2 = inlined_call_operand.vmem [shape: f32[8,3], index: 2, kind: input, shape index: {}]   ;;  %s465_s3 = inlined_call_operand.vmem [shape: f32[16,8], index: 3, kind: input, shape index: {}]   ;;  %s466_s4 = inlined_call_operand.hbm [shape: f32[16,256], index: 4, kind: output, shape index: {}]  }
   0x1   :  { %v26_v0 = vld [vmem:[%s464_s2] sm:$0xff]  ;;  %356 = vset.pattern.permute.xlu1 %v396_v2  ;;  %354 = vset.pattern.permute.xlu0 %v397_v3 }
   0x2   :  { %v23_v1 = vld [vmem:[%s463_s1] sm:$0xff] }
   0x3   :  { %v24_v4 = vunpack.c.l.bf16 %v23_v1  ;;  %v25_v5 = vunpack.c.h.bf16 %v23_v1 }
   0x4   :  { %9 = vsyncpa [#allocation5], 0  ;;  %84 = vperm.xlu1 %356, %v26_v0   ;;  %38 = vperm.xlu0 %354, %v26_v0   ;;  %v398_v7 = vmov 0   ;;  %s399_s19 = smov 1   ;;  %s400_s2 = smov 127   ;;  %v28_v8 = vlaneseq  ;;  %vm118_vm14 = vcmask 1043456  }
   0x5   :  { %v357_v6 = vpack.i.bf16 %v25_v5, %v24_v4  ;;  %157 = vmatprep.mubr.bf16.mxu0 %v398_v7  ;;  %v27_v11 = vld [vmem:[%s462_s0] sm:$0x3]  ;;  %vm114_vm15 = vcmask 64512   ;;  %v106_v49 = vld [vmem:[%s465_s3 + $0x8] sm:$0xff] }
   0x6   :  { %v29_v9 = vshrl.u32 %v28_v8, 7  ;;  %v48_v17 = vand.u32 127, %v28_v8  ;;  %v105_v48 = vld [vmem:[%s465_s3] sm:$0xff]  ;;  %s401_s3 = smov [#allocation4]  }
   0x7   :  { %343 = vmatprep.mubr.msk.f32.mxu1 %vm114_vm15, %v105_v48  ;;  %v107_v50 = vpack.c.bf16 %v106_v49, %v105_v48  ;;  %s317_s24 = sshll.u32 %s401_s3, 4  ;;  %s318_s24 = int_to_ptr.vmem [resolvable:$true] %s317_s24 }
   0x8   :  { %355 = vset.pattern.permute.xlu0 %v398_v7  ;;  %358 = vrot.lane.b32.xlu1 %v357_v6, %s399_s19  ;;  %v30_v10 = vsub.s32 0, %v29_v9  ;;  %v34_v12 = vsub.s32 1, %v29_v9  ;;  %vm49_vm4 = vcmp.lt.s32.totalorder %v48_v17, 1  ;;  %vm72_vm11 = vcmp.lt.s32.totalorder %v48_v17, 127  ;;  %s372_s25 = scalar_lea.vmem %s318_s24, 512  ;;  %p377_p1 = scmp.lt.s32.totalorder %s318_s24, %s318_s24 }
   0x9   :  { %61 = vperm.xlu0 %355, %v26_v0   ;;  %367 = vset.pattern.permute.xlu1 %v398_v7  ;;  %p373_p0 = scmp.ne.s32.totalorder %s318_s24, %s372_s25  ;;  %p378_p2 = scmp.lt.s32.totalorder %s372_s25, %s372_s25 }
   0xa   :  { %v31_v13 = vrot.slane %v27_v11, %v30_v10  ;;  %v35_v14 = vrot.slane %v27_v11, %v34_v12 }
   0xb   :  { %p379_p3 = por %p378_p2, %p377_p1 }
   0xc   :  { %363 = vrot.lane.b32.xlu1 %v357_v6, %s400_s2  ;;  %vm52_vm0 = vcmp.ge.s32.totalorder %v31_v13, 1  ;;  %vm54_vm1 = vcmp.lt.s32.totalorder %v31_v13, 121  ;;  %vm53_vm2 = vcmp.ge.s32.totalorder %v35_v14, 1  ;;  %vm55_vm3 = vcmp.lt.s32.totalorder %v35_v14, 121 }
   0xd   :  { %vm438_vm5 = vmand %vm52_vm0, %vm54_vm1  ;;  %vm76_vm7 = vcmp.ge.s32.totalorder %v35_v14, 4294967295  ;;  %vm78_vm8 = vcmp.lt.s32.totalorder %v35_v14, 119  ;;  %vm75_vm9 = vcmp.ge.s32.totalorder %v31_v13, 4294967295  ;;  %vm77_vm10 = vcmp.lt.s32.totalorder %v31_v13, 119  ;;  %p380_p4 = pnand %p379_p3, %p373_p0 }
   0xe   :  { %vm57_vm6 = vmand %vm53_vm2, %vm55_vm3  ;;  %vm94_vm0 = vcmask 7168  }
   0xf   :  { %vm80_vm12 = vmand %vm76_vm7, %vm78_vm8 }
  0x10   :  { %vm79_vm13 = vmand %vm75_vm9, %vm77_vm10 }
  0x83   :  { %v85_v15 = vpop.permute.xlu1 %84  ;;  %v39_v16 = vpop.permute.xlu0 %38 }
  0x84   :  { %v41_v32 = vmul.f32 %v39_v16, %v24_v4  ;;  %v42_v33 = vmul.f32 %v39_v16, %v25_v5 }
  0x87   :  { %v359_v18 = vpop.permute.xlu1 %358 }
  0x88   :  { %v361_v20 = vunpack.i.h.bf16 %v359_v18  ;;  %v360_v21 = vunpack.i.l.bf16 %v359_v18  ;;  %v62_v22 = vpop.permute.xlu0 %61 }
  0x8a   :  { %v50_v23 = vsel %vm49_vm4, %v360_v21, %v361_v20  ;;  %v51_v24 = vsel %vm49_vm4, %v361_v20, %v360_v21 }
  0x8b   :  { %v58_v25 = vsel %vm438_vm5, %v51_v24, 0.0  ;;  %v59_v26 = vsel %vm57_vm6, %v50_v23, 0.0  ;;  %v364_v27 = vpop.permute.xlu1 %363 }
  0x8c   :  { %v64_v28 = vmul.f32 %v62_v22, %v58_v25  ;;  %v65_v29 = vmul.f32 %v62_v22, %v59_v26  ;;  %v366_v30 = vunpack.i.h.bf16 %v364_v27  ;;  %v365_v31 = vunpack.i.l.bf16 %v364_v27 }
  0x8e   :  { %v73_v34 = vsel %vm72_vm11, %v365_v31, %v366_v30  ;;  %v74_v35 = vsel %vm72_vm11, %v366_v30, %v365_v31  ;;  %v66_v38 = vadd.f32 %v64_v28, %v41_v32  ;;  %v67_v39 = vadd.f32 %v65_v29, %v42_v33 }
  0x8f   :  { %v82_v36 = vsel %vm80_vm12, %v74_v35, 0.0  ;;  %v81_v37 = vsel %vm79_vm13, %v73_v34, 0.0 }
  0x90   :  { %v88_v40 = vmul.f32 %v85_v15, %v82_v36  ;;  %v87_v41 = vmul.f32 %v85_v15, %v81_v37 }
  0x92   :  { %v90_v42 = vadd.f32 %v88_v40, %v67_v39  ;;  %v89_v43 = vadd.f32 %v87_v41, %v66_v38 }
  0x94   :  { %v337_v44 = vpack.c.bf16 %v90_v42, %v90_v42  ;;  %v91_v45 = vadd.f32 %v90_v42, %v89_v43  ;;  %v336_v46 = vpack.c.bf16 %v89_v43, %v89_v43 }
  0x96   :  { %331 = vmatprep.subr.msk.bf16.mxu0 %vm118_vm14, %v337_v44  ;;  %92 = vadd.xlane.f32.xlu0 %v91_v45  ;;  %v120_v47 = vsel %vm118_vm14, %v336_v46, 0 }
  0x97   :  { %126 = vmatpush1.bf16.msra.mxu0 %v120_v47 }
  0x9a   :  { %332 = vmatmul.mubr.msk.bf16.vlgmr.msra.gmra.mrb[0].mxu0 %vm114_vm15, %v107_v50 }
 0x123   :  { %v93_v51 = vpop.xlane.xlu0 %92 }
 0x124   :  { %95 = vst.msk [vmem:[#allocation3] sm:$0xff] %vm94_vm0, %v93_v51 }
 0x12b   :  { %v168_v52 = vld [vmem:[#allocation3] sm:$0xff] }
 0x12c   :  { %341 = vmatprep.subr.mxu1 %v168_v52 }
 0x12d   :  { %342 = vmatpush3.msra.mxu1 %v168_v52 }
 0x12e   :  { %344 = vmatmul.mubr.msk.f32.vlgmr.msra.gmra.mrb[0].mxu1 %vm114_vm15, %v106_v49 }
 0x16d   :  { %v159_v53 = vpop.f32.mrb[0].mxu0 }
 0x16e   :  { %v161_v54 = vpop.f32.mrb[1].mxu0 }
 0x16f   :  { %v163_v55 = vpop.f32.mrb[2].mxu0 }
 0x170   :  { %v165_v59 = vpop.f32.mrb[3].mxu0 }
 0x201   :  { %v345_v56 = vpop.f32.mrb[0].mxu1 }
 0x202   :  { %v241_v57 = vpop.f32.mrb[1].mxu1  ;;  %v251_v60 = vmul.f32 0.004166667, %v345_v56 }
 0x203   :  { %v250_v58 = vmul.f32 0.004166667, %v241_v57 }
 0x204   :  { %v277_v11 = vmul.f32 16.0, %v251_v60 }
 0x205   :  { %254 = vperm.xlu1 %367, %v250_v58   ;;  %v276_v9 = vmul.f32 16.0, %v250_v58 }
 0x206   :  { %v279_v15 = vmul.f32 %v277_v11, %v251_v60 }
 0x207   :  { %v278_v10 = vmul.f32 %v276_v9, %v250_v58 }
 0x209   :  { %259 = vperm.xlu1 %367, %v251_v60  }
 0x284   :  { %v255_v61 = vpop.permute.xlu1 %254 }
 0x285   :  { %v262_v62 = vsub.f32 %v159_v53, %v255_v61  ;;  %v263_v63 = vsub.f32 %v161_v54, %v255_v61 }
 0x287   :  { %v266_v0 = vmul.f32 %v262_v62, %v262_v62  ;;  %v267_v1 = vmul.f32 %v263_v63, %v263_v63 }
 0x288   :  { %v260_v2 = vpop.permute.xlu1 %259 }
 0x289   :  { %v264_v3 = vsub.f32 %v163_v55, %v260_v2  ;;  %v265_v4 = vsub.f32 %v165_v59, %v260_v2  ;;  %v270_v5 = vadd.f32 %v267_v1, %v266_v0 }
 0x28b   :  { %271 = vadd.xlane.f32.xlu1 %v270_v5  ;;  %v268_v6 = vmul.f32 %v264_v3, %v264_v3  ;;  %v269_v7 = vmul.f32 %v265_v4, %v265_v4 }
 0x28d   :  { %v273_v8 = vadd.f32 %v269_v7, %v268_v6 }
 0x28f   :  { %274 = vadd.xlane.f32.xlu0 %v273_v8 }
 0x318   :  { %v272_v12 = vpop.xlane.xlu1 %271 }
 0x319   :  { %v280_v13 = vsub.f32 %v272_v12, %v278_v10 }
 0x31b   :  { %v282_v14 = vmul.f32 0.004166667, %v280_v13 }
 0x31c   :  { %v275_v16 = vpop.xlane.xlu0 %274 }
 0x31d   :  { %v284_v17 = vmax.f32 %v282_v14, 0.0  ;;  %v281_v18 = vsub.f32 %v275_v16, %v279_v15 }
 0x31f   :  { %v286_v19 = vadd.f32 1e-05, %v284_v17  ;;  %v283_v20 = vmul.f32 0.004166667, %v281_v18 }
 0x321   :  { %368 = vrsqrt.f32 %v286_v19  ;;  %v285_v21 = vmax.f32 %v283_v20, 0.0 }
 0x323   :  { %v287_v22 = vadd.f32 1e-05, %v285_v21 }
 0x325   :  { %370 = vrsqrt.f32 %v287_v22 }
 0x32b   :  { %v369_v23 = vpop.eup %368 }
 0x32c   :  { %292 = vperm.xlu0 %355, %v369_v23  }
 0x32f   :  { %v371_v24 = vpop.eup %370 }
 0x330   :  { %297 = vperm.xlu1 %367, %v371_v24  }
 0x3ab   :  { %v293_v25 = vpop.permute.xlu0 %292 }
 0x3ac   :  { %v300_v26 = vmul.f32 %v293_v25, %v262_v62  ;;  %v301_v27 = vmul.f32 %v293_v25, %v263_v63 }
 0x3ae   :  { %v304_v28 = vmax.f32 %v300_v26, 0.0  ;;  %v305_v29 = vmax.f32 %v301_v27, 0.0 }
 0x3af   :  { %v298_v30 = vpop.permute.xlu1 %297 }
 0x3b0   :  { %308 = vst [vmem:[#allocation4] sm:$0xff] %v304_v28  ;;  %309 = vst [vmem:[#allocation4 + $0x8] sm:$0xff] %v305_v29  ;;  %v302_v31 = vmul.f32 %v298_v30, %v264_v3  ;;  %v303_v32 = vmul.f32 %v298_v30, %v265_v4 }
 0x3b2   :  { %v306_v33 = vmax.f32 %v302_v31, 0.0  ;;  %v307_v34 = vmax.f32 %v303_v32, 0.0 }
 0x3b4   :  { %310 = vst [vmem:[#allocation4 + $0x10] sm:$0xff] %v306_v33  ;;  %311 = vst [vmem:[#allocation4 + $0x18] sm:$0xff] %v307_v34 }
 0x3b5   :  { %383 = shalt.err (!%p380_p4)
}
 0x3b6   :  { %s384_s28 = scalar_lea.hbm %s466_s4, 512 }
 0x3b7   :  { %p385_p5 = scmp.ne.s32.totalorder %s466_s4, %s384_s28  ;;  %p388_p6 = scmp.lt.u32.totalorder %s384_s28, %s466_s4 }
 0x3b9   :  { %p390_p7 = pnand %p388_p6, %p385_p5 }
 0x3bb   :  { %393 = shalt.err (!%p390_p7)
}
 0x3bc   :  { %s402_s7 = smov 256   ;;  %s403_s8 = smov 16  }
 0x3bd   :  { %323 = dma.vmem_to_hbm [thread:$0]  %s318_s24, 512, %s466_s4, [#allocation5], %s402_s7, %s402_s7, %s403_s8  }
 0x3be   :  { %394 = dma.done.wait [#allocation5], 512  }
 0x3bf   :  { %395 = vsyncadd [#allocation5], 4294966784 }
 0x3c0   :  { %327 = vsyncpa [#allocation5], 1 }

// kernel: tpu_custom_call.1
= control target key start
LH: loop header
LB: loop body
LE: loop exit
PB: predicated region body
PF: predicated region fallthrough
CT: control target
= control target key end

     0   :  { %v396_v2 = vmov 2   ;;  %v397_v3 = vmov 1   ;;  %s462_s0 = inlined_call_operand.vmem [shape: s32[1,256], index: 0, kind: input, shape index: {}]   ;;  %s463_s1 = inlined_call_operand.vmem [shape: bf16[8,256], index: 1, kind: input, shape index: {}]   ;;  %s464_s2 = inlined_call_operand.vmem [shape: f32[8,3], index: 2, kind: input, shape index: {}]   ;;  %s465_s3 = inlined_call_operand.vmem [shape: f32[16,8], index: 3, kind: input, shape index: {}]   ;;  %s466_s4 = inlined_call_operand.hbm [shape: f32[16,256], index: 4, kind: output, shape index: {}]  }
   0x1   :  { %v26_v0 = vld [vmem:[%s464_s2] sm:$0xff]  ;;  %356 = vset.pattern.permute.xlu1 %v396_v2  ;;  %354 = vset.pattern.permute.xlu0 %v397_v3 }
   0x2   :  { %v23_v1 = vld [vmem:[%s463_s1] sm:$0xff] }
   0x3   :  { %v24_v4 = vunpack.c.l.bf16 %v23_v1  ;;  %v25_v5 = vunpack.c.h.bf16 %v23_v1 }
   0x4   :  { %9 = vsyncpa [#allocation5], 0  ;;  %84 = vperm.xlu1 %356, %v26_v0   ;;  %38 = vperm.xlu0 %354, %v26_v0   ;;  %v398_v7 = vmov 0   ;;  %s399_s19 = smov 1   ;;  %s400_s2 = smov 127   ;;  %v28_v8 = vlaneseq  ;;  %vm118_vm14 = vcmask 1043456  }
   0x5   :  { %v357_v6 = vpack.i.bf16 %v25_v5, %v24_v4  ;;  %157 = vmatprep.mubr.bf16.mxu0 %v398_v7  ;;  %v27_v11 = vld [vmem:[%s462_s0] sm:$0x3]  ;;  %vm114_vm15 = vcmask 64512   ;;  %v106_v49 = vld [vmem:[%s465_s3 + $0x8] sm:$0xff] }
   0x6   :  { %v29_v9 = vshrl.u32 %v28_v8, 7  ;;  %v48_v17 = vand.u32 127, %v28_v8  ;;  %v105_v48 = vld [vmem:[%s465_s3] sm:$0xff]  ;;  %s401_s3 = smov [#allocation4]  }
   0x7   :  { %343 = vmatprep.mubr.msk.f32.mxu1 %vm114_vm15, %v105_v48  ;;  %v107_v50 = vpack.c.bf16 %v106_v49, %v105_v48  ;;  %s317_s24 = sshll.u32 %s401_s3, 4  ;;  %s318_s24 = int_to_ptr.vmem [resolvable:$true] %s317_s24 }
   0x8   :  { %355 = vset.pattern.permute.xlu0 %v398_v7  ;;  %358 = vrot.lane.b32.xlu1 %v357_v6, %s399_s19  ;;  %v30_v10 = vsub.s32 0, %v29_v9  ;;  %v34_v12 = vsub.s32 1, %v29_v9  ;;  %vm49_vm4 = vcmp.lt.s32.totalorder %v48_v17, 1  ;;  %vm72_vm11 = vcmp.lt.s32.totalorder %v48_v17, 127  ;;  %s372_s25 = scalar_lea.vmem %s318_s24, 512  ;;  %p377_p1 = scmp.lt.s32.totalorder %s318_s24, %s318_s24 }
   0x9   :  { %61 = vperm.xlu0 %355, %v26_v0   ;;  %367 = vset.pattern.permute.xlu1 %v398_v7  ;;  %p373_p0 = scmp.ne.s32.totalorder %s318_s24, %s372_s25  ;;  %p378_p2 = scmp.lt.s32.totalorder %s372_s25, %s372_s25 }
   0xa   :  { %v31_v13 = vrot.slane %v27_v11, %v30_v10  ;;  %v35_v14 = vrot.slane %v27_v11, %v34_v12 }
   0xb   :  { %p379_p3 = por %p378_p2, %p377_p1 }
   0xc   :  { %363 = vrot.lane.b32.xlu1 %v357_v6, %s400_s2  ;;  %vm52_vm0 = vcmp.ge.s32.totalorder %v31_v13, 1  ;;  %vm54_vm1 = vcmp.lt.s32.totalorder %v31_v13, 121  ;;  %vm53_vm2 = vcmp.ge.s32.totalorder %v35_v14, 1  ;;  %vm55_vm3 = vcmp.lt.s32.totalorder %v35_v14, 121 }
   0xd   :  { %vm438_vm5 = vmand %vm52_vm0, %vm54_vm1  ;;  %vm76_vm7 = vcmp.ge.s32.totalorder %v35_v14, 4294967295  ;;  %vm78_vm8 = vcmp.lt.s32.totalorder %v35_v14, 119  ;;  %vm75_vm9 = vcmp.ge.s32.totalorder %v31_v13, 4294967295  ;;  %vm77_vm10 = vcmp.lt.s32.totalorder %v31_v13, 119  ;;  %p380_p4 = pnand %p379_p3, %p373_p0 }
   0xe   :  { %vm57_vm6 = vmand %vm53_vm2, %vm55_vm3  ;;  %vm94_vm0 = vcmask 7168  }
   0xf   :  { %vm80_vm12 = vmand %vm76_vm7, %vm78_vm8 }
  0x10   :  { %vm79_vm13 = vmand %vm75_vm9, %vm77_vm10 }
  0x83   :  { %v85_v15 = vpop.permute.xlu1 %84  ;;  %v39_v16 = vpop.permute.xlu0 %38 }
  0x84   :  { %v41_v32 = vmul.f32 %v39_v16, %v24_v4  ;;  %v42_v33 = vmul.f32 %v39_v16, %v25_v5 }
  0x87   :  { %v359_v18 = vpop.permute.xlu1 %358 }
  0x88   :  { %v361_v20 = vunpack.i.h.bf16 %v359_v18  ;;  %v360_v21 = vunpack.i.l.bf16 %v359_v18  ;;  %v62_v22 = vpop.permute.xlu0 %61 }
  0x8a   :  { %v50_v23 = vsel %vm49_vm4, %v360_v21, %v361_v20  ;;  %v51_v24 = vsel %vm49_vm4, %v361_v20, %v360_v21 }
  0x8b   :  { %v58_v25 = vsel %vm438_vm5, %v51_v24, 0.0  ;;  %v59_v26 = vsel %vm57_vm6, %v50_v23, 0.0  ;;  %v364_v27 = vpop.permute.xlu1 %363 }
  0x8c   :  { %v64_v28 = vmul.f32 %v62_v22, %v58_v25  ;;  %v65_v29 = vmul.f32 %v62_v22, %v59_v26  ;;  %v366_v30 = vunpack.i.h.bf16 %v364_v27  ;;  %v365_v31 = vunpack.i.l.bf16 %v364_v27 }
  0x8e   :  { %v73_v34 = vsel %vm72_vm11, %v365_v31, %v366_v30  ;;  %v74_v35 = vsel %vm72_vm11, %v366_v30, %v365_v31  ;;  %v66_v38 = vadd.f32 %v64_v28, %v41_v32  ;;  %v67_v39 = vadd.f32 %v65_v29, %v42_v33 }
  0x8f   :  { %v82_v36 = vsel %vm80_vm12, %v74_v35, 0.0  ;;  %v81_v37 = vsel %vm79_vm13, %v73_v34, 0.0 }
  0x90   :  { %v88_v40 = vmul.f32 %v85_v15, %v82_v36  ;;  %v87_v41 = vmul.f32 %v85_v15, %v81_v37 }
  0x92   :  { %v90_v42 = vadd.f32 %v88_v40, %v67_v39  ;;  %v89_v43 = vadd.f32 %v87_v41, %v66_v38 }
  0x94   :  { %v337_v44 = vpack.c.bf16 %v90_v42, %v90_v42  ;;  %v91_v45 = vadd.f32 %v90_v42, %v89_v43  ;;  %v336_v46 = vpack.c.bf16 %v89_v43, %v89_v43 }
  0x96   :  { %331 = vmatprep.subr.msk.bf16.mxu0 %vm118_vm14, %v337_v44  ;;  %92 = vadd.xlane.f32.xlu0 %v91_v45  ;;  %v120_v47 = vsel %vm118_vm14, %v336_v46, 0 }
  0x97   :  { %126 = vmatpush1.bf16.msra.mxu0 %v120_v47 }
  0x9a   :  { %332 = vmatmul.mubr.msk.bf16.vlgmr.msra.gmra.mrb[0].mxu0 %vm114_vm15, %v107_v50 }
 0x123   :  { %v93_v51 = vpop.xlane.xlu0 %92 }
 0x124   :  { %95 = vst.msk [vmem:[#allocation3] sm:$0xff] %vm94_vm0, %v93_v51 }
 0x12b   :  { %v168_v52 = vld [vmem:[#allocation3] sm:$0xff] }
 0x12c   :  { %341 = vmatprep.subr.mxu1 %v168_v52 }
 0x12d   :  { %342 = vmatpush3.msra.mxu1 %v168_v52 }
 0x12e   :  { %344 = vmatmul.mubr.msk.f32.vlgmr.msra.gmra.mrb[0].mxu1 %vm114_vm15, %v106_v49 }
 0x16d   :  { %v159_v53 = vpop.f32.mrb[0].mxu0 }
 0x16e   :  { %v161_v54 = vpop.f32.mrb[1].mxu0 }
 0x16f   :  { %v163_v55 = vpop.f32.mrb[2].mxu0 }
 0x170   :  { %v165_v59 = vpop.f32.mrb[3].mxu0 }
 0x201   :  { %v345_v56 = vpop.f32.mrb[0].mxu1 }
 0x202   :  { %v241_v57 = vpop.f32.mrb[1].mxu1  ;;  %v251_v60 = vmul.f32 0.004166667, %v345_v56 }
 0x203   :  { %v250_v58 = vmul.f32 0.004166667, %v241_v57 }
 0x204   :  { %v277_v11 = vmul.f32 16.0, %v251_v60 }
 0x205   :  { %254 = vperm.xlu1 %367, %v250_v58   ;;  %v276_v9 = vmul.f32 16.0, %v250_v58 }
 0x206   :  { %v279_v15 = vmul.f32 %v277_v11, %v251_v60 }
 0x207   :  { %v278_v10 = vmul.f32 %v276_v9, %v250_v58 }
 0x209   :  { %259 = vperm.xlu1 %367, %v251_v60  }
 0x284   :  { %v255_v61 = vpop.permute.xlu1 %254 }
 0x285   :  { %v262_v62 = vsub.f32 %v159_v53, %v255_v61  ;;  %v263_v63 = vsub.f32 %v161_v54, %v255_v61 }
 0x287   :  { %v266_v0 = vmul.f32 %v262_v62, %v262_v62  ;;  %v267_v1 = vmul.f32 %v263_v63, %v263_v63 }
 0x288   :  { %v260_v2 = vpop.permute.xlu1 %259 }
 0x289   :  { %v264_v3 = vsub.f32 %v163_v55, %v260_v2  ;;  %v265_v4 = vsub.f32 %v165_v59, %v260_v2  ;;  %v270_v5 = vadd.f32 %v267_v1, %v266_v0 }
 0x28b   :  { %271 = vadd.xlane.f32.xlu1 %v270_v5  ;;  %v268_v6 = vmul.f32 %v264_v3, %v264_v3  ;;  %v269_v7 = vmul.f32 %v265_v4, %v265_v4 }
 0x28d   :  { %v273_v8 = vadd.f32 %v269_v7, %v268_v6 }
 0x28f   :  { %274 = vadd.xlane.f32.xlu0 %v273_v8 }
 0x318   :  { %v272_v12 = vpop.xlane.xlu1 %271 }
 0x319   :  { %v280_v13 = vsub.f32 %v272_v12, %v278_v10 }
 0x31b   :  { %v282_v14 = vmul.f32 0.004166667, %v280_v13 }
 0x31c   :  { %v275_v16 = vpop.xlane.xlu0 %274 }
 0x31d   :  { %v284_v17 = vmax.f32 %v282_v14, 0.0  ;;  %v281_v18 = vsub.f32 %v275_v16, %v279_v15 }
 0x31f   :  { %v286_v19 = vadd.f32 1e-05, %v284_v17  ;;  %v283_v20 = vmul.f32 0.004166667, %v281_v18 }
 0x321   :  { %368 = vrsqrt.f32 %v286_v19  ;;  %v285_v21 = vmax.f32 %v283_v20, 0.0 }
 0x323   :  { %v287_v22 = vadd.f32 1e-05, %v285_v21 }
 0x325   :  { %370 = vrsqrt.f32 %v287_v22 }
 0x32b   :  { %v369_v23 = vpop.eup %368 }
 0x32c   :  { %292 = vperm.xlu0 %355, %v369_v23  }
 0x32f   :  { %v371_v24 = vpop.eup %370 }
 0x330   :  { %297 = vperm.xlu1 %367, %v371_v24  }
 0x3ab   :  { %v293_v25 = vpop.permute.xlu0 %292 }
 0x3ac   :  { %v300_v26 = vmul.f32 %v293_v25, %v262_v62  ;;  %v301_v27 = vmul.f32 %v293_v25, %v263_v63 }
 0x3ae   :  { %v304_v28 = vmax.f32 %v300_v26, 0.0  ;;  %v305_v29 = vmax.f32 %v301_v27, 0.0 }
 0x3af   :  { %v298_v30 = vpop.permute.xlu1 %297 }
 0x3b0   :  { %308 = vst [vmem:[#allocation4] sm:$0xff] %v304_v28  ;;  %309 = vst [vmem:[#allocation4 + $0x8] sm:$0xff] %v305_v29  ;;  %v302_v31 = vmul.f32 %v298_v30, %v264_v3  ;;  %v303_v32 = vmul.f32 %v298_v30, %v265_v4 }
 0x3b2   :  { %v306_v33 = vmax.f32 %v302_v31, 0.0  ;;  %v307_v34 = vmax.f32 %v303_v32, 0.0 }
 0x3b4   :  { %310 = vst [vmem:[#allocation4 + $0x10] sm:$0xff] %v306_v33  ;;  %311 = vst [vmem:[#allocation4 + $0x18] sm:$0xff] %v307_v34 }
 0x3b5   :  { %383 = shalt.err (!%p380_p4)
}
 0x3b6   :  { %s384_s28 = scalar_lea.hbm %s466_s4, 512 }
 0x3b7   :  { %p385_p5 = scmp.ne.s32.totalorder %s466_s4, %s384_s28  ;;  %p388_p6 = scmp.lt.u32.totalorder %s384_s28, %s466_s4 }
 0x3b9   :  { %p390_p7 = pnand %p388_p6, %p385_p5 }
 0x3bb   :  { %393 = shalt.err (!%p390_p7)
}
 0x3bc   :  { %s402_s7 = smov 256   ;;  %s403_s8 = smov 16  }
 0x3bd   :  { %323 = dma.vmem_to_hbm [thread:$0]  %s318_s24, 512, %s466_s4, [#allocation5], %s402_s7, %s402_s7, %s403_s8  }
 0x3be   :  { %394 = dma.done.wait [#allocation5], 512  }
 0x3bf   :  { %395 = vsyncadd [#allocation5], 4294966784 }
 0x3c0   :  { %327 = vsyncpa [#allocation5], 1 }

</bundles_post_ra>
